<compile_context>
chip_gen: v7x
topology: tpu7x:2x2x1
jax: 0.10.0
libtpu: 0.0.40
codegen_flags: <defaults>
</compile_context>

<pallas_src>
import numpy as np
import jax
import jax.numpy as jnp
from jax.experimental import pallas as pl
from jax.experimental.pallas import tpu as pltpu


_VMEM_LIMIT_BYTES = 32 * 1024 * 1024    # explicit scoped-VMEM limit (safe on all gens)
_VMEM_BLOCK_BUDGET = 24 * 1024 * 1024   # budget for pipelined blocks (leaves headroom)


def _build_pe(d_model: int, max_len: int = 5000) -> jnp.ndarray:
    """Positional table identical to the PyTorch module's __init__ (float32)."""
    position = jnp.arange(max_len, dtype=jnp.float32)[:, None]
    div_term = jnp.exp(
        jnp.arange(0, d_model, 2, dtype=jnp.float32) * (-np.log(10000.0) / d_model)
    )
    pe = jnp.zeros((1, max_len, d_model), dtype=jnp.float32)
    pe = pe.at[0, :, 0::2].set(jnp.sin(position * div_term))
    pe = pe.at[0, :, 1::2].set(jnp.cos(position * div_term))
    return pe


def _add_pe_kernel(x_ref, pe_ref, o_ref):
    # VPU elementwise add; the pe block broadcasts over the block's batch rows
    # when its row extent is 1 (un-folded layout).  HBM-bandwidth bound.
    o_ref[...] = x_ref[...] + pe_ref[...]


def _round_up(x, m):
    return ((x + m - 1) // m) * m


def _round_down(x, m):
    return (x // m) * m


def _block_bytes(tr, tc, pe_rows, itemsize, pack):
    """Padded VMEM bytes of one grid step's live blocks, incl. double buffering."""
    pr = _round_up(tr, pack)
    pc = _round_up(tc, 128)
    pe_pr = _round_up(pe_rows, pack)
    return 2 * (2 * pr + pe_pr) * pc * itemsize


def _choose_fold(B, S, D, pack):
    """Smallest divisor S1 of S that fills the sublane axis while keeping the
    flattened column axis lane-dense; 1 means 'do not fold'."""
    if B >= pack:
        return 1
    for s1 in range(pack, min(S, 256) + 1):
        if S % s1 == 0 and (S // s1) * D >= 128:
            return s1
    return 1


def _choose_tiles(rows, cols, S1, itemsize, pack):
    """(row_tile, col_tile) whose (pack,128)-padded footprint fits the budget.
    Prefers full-width (contiguous, lane-dense) column tiles, shrinking rows
    first; only tiles columns when one row-group is still too wide."""
    budget = _VMEM_BLOCK_BUDGET
    pe_rows = 1 if S1 == 1 else S1
    pe_pr = _round_up(pe_rows, pack)

    def fits(tr, tc):
        return _block_bytes(tr, tc, pe_rows, itemsize, pack) <= budget

    tr_full = rows if S1 == 1 else S1        # fold: one batch element's rows per block
    if fits(tr_full, cols):
        return tr_full, cols

    if S1 == 1:
        # Keep full-width columns, shrink the (batch) row tile.
        pc = _round_up(cols, 128)
        max_pr = (budget // (2 * pc * itemsize) - pe_pr) // 2
        tr = _round_down(max_pr, pack)
        if tr >= pack:
            return min(tr, rows), cols
        tr = pack
    else:
        tr = S1

    # Columns too wide even for a minimal row tile: tile the column axis.
    denom = 2 * (2 * _round_up(tr, pack) + pe_pr) * itemsize
    tc = max(128, _round_down(budget // denom, 128))
    return tr, min(tc, _round_up(cols, 128))


def _maybe_split_for_two_cores(tr, tc, rows, cols, itemsize, pack, allow_row_split):
    """If the whole op fits a single grid step but the slab is large, split it
    into two even 'parallel' steps so v7x's two TensorCores both get work."""
    if rows * cols * itemsize < (4 << 20):
        return tr, tc
    if pl.cdiv(rows, tr) * pl.cdiv(cols, tc) >= 2:
        return tr, tc
    if allow_row_split and rows >= 2 * pack:
        return _round_up(pl.cdiv(rows, 2), pack), tc
    if cols >= 2 * 128:
        return tr, _round_up(pl.cdiv(cols, 2), 128)
    return tr, tc


class PositionalEncoding:
    """JAX/Pallas port of the PyTorch module: __call__(x) == x + pe[:, :x.shape[1]]."""

    def __init__(self, d_model, max_len=5000):
        self.d_model = d_model
        self.max_len = max_len
        self.pe = _build_pe(d_model, max_len)     # (1, max_len, d_model) float32
        self._pe_slab_cache = {}                  # (S, S1, dtype) -> flattened slab

    def _pe_slab(self, S, S1, dtype):
        key = (S, S1, jnp.dtype(dtype).name)
        slab = self._pe_slab_cache.get(key)
        if slab is None:
            # Static preprocessing, done once per (seq_len, fold, dtype).
            # NOTE: PyTorch promotes the add to float32 for low-precision x; here
            # pe is cast to x.dtype so the output keeps x's dtype (negligible diff).
            slab = self.pe[0, :S, :].reshape(S1, (S // S1) * self.d_model).astype(dtype)
            self._pe_slab_cache[key] = slab
        return slab

    def __call__(self, x):
        B, S, D = x.shape
        if D != self.d_model or S > self.max_len:
            raise ValueError("input shape incompatible with this PositionalEncoding")

        itemsize = jnp.dtype(x.dtype).itemsize
        pack = max(8, 32 // itemsize)             # sublane pack: 8 f32 / 16 bf16 / 32 i8

        S1 = _choose_fold(B, S, D, pack)
        rows, cols = B * S1, (S // S1) * D
        x2 = x.reshape(rows, cols)
        pe2 = self._pe_slab(S, S1, x.dtype)       # (S1, cols)

        tr, tc = _choose_tiles(rows, cols, S1, itemsize, pack)
        tr, tc = _maybe_split_for_two_cores(
            tr, tc, rows, cols, itemsize, pack, allow_row_split=(S1 == 1)
        )
        grid = (pl.cdiv(rows, tr), pl.cdiv(cols, tc))

        out2 = pl.pallas_call(
            _add_pe_kernel,
            out_shape=jax.ShapeDtypeStruct((rows, cols), x.dtype),
            grid=grid,
            in_specs=[
                pl.BlockSpec((tr, tc), lambda r, c: (r, c)),          # x tile
                pl.BlockSpec((pe2.shape[0], tc), lambda r, c: (0, c)),  # pe: col tile only
            ],
            out_specs=pl.BlockSpec((tr, tc), lambda r, c: (r, c)),
            compiler_params=pltpu.CompilerParams(
                dimension_semantics=("parallel", "parallel"),
                vmem_limit_bytes=_VMEM_LIMIT_BYTES,
            ),
        )(x2, pe2)

        return out2.reshape(B, S, D)


if __name__ == "__main__":
    # Small shapes consistent with the module's forward: (batch, seq, d_model).
    B, S, D = 2, 8, 32
    posenc = PositionalEncoding(d_model=D, max_len=5000)

    key = jax.random.PRNGKey(0)
    x = jax.random.normal(key, (B, S, D), dtype=jnp.float32)

    out = jax.block_until_ready(posenc(x))

    ref = x + posenc.pe[:, :S, :]
    np.testing.assert_allclose(np.asarray(out), np.asarray(ref), rtol=1e-6, atol=1e-6)

    # Extra small shapes exercising (a) batch bigger than a sublane pack and
    # (b) the small-batch sequence fold path.
    for (b2, s2, d2) in [(16, 8, 32), (2, 64, 128)]:
        mod = PositionalEncoding(d_model=d2, max_len=5000)
        x2 = jax.random.normal(jax.random.PRNGKey(1), (b2, s2, d2), dtype=jnp.float32)
        o2 = jax.block_until_ready(mod(x2))
        r2 = x2 + mod.pe[:, :s2, :]
        np.testing.assert_allclose(np.asarray(o2), np.asarray(r2), rtol=1e-6, atol=1e-6)

    print("KERNEL_OK")
</pallas_src>

<mosaic_0001>
module attributes {stable_mosaic.version = 11 : i64} {
  func.func @_add_pe_kernel(%arg0: i32, %arg1: i32, %arg2: memref<2x256xf32, #tpu.memory_space<vmem>>, %arg3: memref<1x256xf32, #tpu.memory_space<vmem>>, %arg4: memref<2x256xf32, #tpu.memory_space<vmem>>) attributes {dimension_semantics = [#tpu.dimension_semantics<parallel>, #tpu.dimension_semantics<parallel>], iteration_bounds = array<i64: 1, 1>, scalar_prefetch = 0 : i64, scratch_operands = 0 : i64, tpu.core_type = #tpu.core_type<tc>, window_params = [{transform_indices = @transform_0, window_bounds = array<i64: 2, 256>}, {transform_indices = @transform_1, window_bounds = array<i64: 1, 256>}, {transform_indices = @transform_2, window_bounds = array<i64: 2, 256>}]} {
    %c0 = arith.constant 0 : index
    %c0_0 = arith.constant 0 : index
    %0 = vector.load %arg2[%c0, %c0_0] : memref<2x256xf32, #tpu.memory_space<vmem>>, vector<2x256xf32>
    %c0_1 = arith.constant 0 : index
    %c0_2 = arith.constant 0 : index
    %1 = vector.load %arg3[%c0_1, %c0_2] : memref<1x256xf32, #tpu.memory_space<vmem>>, vector<1x256xf32>
    %2 = vector.broadcast %1 : vector<1x256xf32> to vector<2x256xf32>
    %3 = arith.addf %0, %2 : vector<2x256xf32>
    %c0_3 = arith.constant 0 : index
    %c0_4 = arith.constant 0 : index
    %4 = vector.load %arg4[%c0_3, %c0_4] : memref<2x256xf32, #tpu.memory_space<vmem>>, vector<2x256xf32>
    tpu.vector_store %arg4[%c0_3, %c0_4], %3 {strides = array<i32>} : memref<2x256xf32, #tpu.memory_space<vmem>>, vector<2x256xf32>,
    return
  }
  func.func @transform_0(%arg0: i32, %arg1: i32) -> (i32, i32) {
    %c0_i32 = arith.constant 0 : i32
    return %arg0, %arg1 : i32, i32
  }
  func.func @transform_1(%arg0: i32, %arg1: i32) -> (i32, i32) {
    %c0_i32 = arith.constant 0 : i32
    %c0_i32_0 = arith.constant 0 : i32
    return %c0_i32, %arg1 : i32, i32
  }
  func.func @transform_2(%arg0: i32, %arg1: i32) -> (i32, i32) {
    %c0_i32 = arith.constant 0 : i32
    return %arg0, %arg1 : i32, i32
  }
}

</mosaic_0001>

<bundles_post_ra>
// kernel: tpu_custom_call.1
= control target key start
LH: loop header
LB: loop body
LE: loop exit
PB: predicated region body
PF: predicated region fallthrough
CT: control target
= control target key end

     0   :  { %7 = vsyncpa [#allocation3], 0  ;;  %s157_s0 = inlined_call_operand.hbm [shape: f32[2,256], index: 0, kind: input, shape index: {}]   ;;  %s158_s1 = inlined_call_operand.vmem [shape: f32[1,256], index: 1, kind: input, shape index: {}]   ;;  %s159_s2 = inlined_call_operand.hbm [shape: f32[2,256], index: 2, kind: output, shape index: {}]  }
   0x1   :  { %8 = vsyncpa [#allocation4], 0  ;;  %s112_s9 = smov [#allocation2]   ;;  %s64_s13 = scalar_lea.hbm %s157_s0, 64 }
   0x2   :  { %s15_s10 = sshll.u32 %s112_s9, 4  ;;  %p65_p0 = scmp.ne.s32.totalorder %s157_s0, %s64_s13  ;;  %s16_s10 = int_to_ptr.vmem [resolvable:$true] %s15_s10 }
   0x3   :  { %p68_p1 = scmp.lt.u32.totalorder %s64_s13, %s157_s0 }
   0x5   :  { %p70_p2 = pnand %p68_p1, %p65_p0 }
   0x7   :  { %73 = shalt.err (!%p70_p2)
}
   0x8   :  { %s74_s18 = scalar_lea.vmem %s16_s10, 64  ;;  %p79_p4 = scmp.lt.s32.totalorder %s16_s10, %s16_s10 }
   0x9   :  { %p75_p3 = scmp.ne.s32.totalorder %s16_s10, %s74_s18  ;;  %p80_p5 = scmp.lt.s32.totalorder %s74_s18, %s74_s18 }
   0xb   :  { %p81_p6 = por %p80_p5, %p79_p4 }
   0xd   :  { %p82_p7 = pnand %p81_p6, %p75_p3 }
   0xf   :  { %85 = shalt.err (!%p82_p7)
}
  0x10   :  { %18 = dma.hbm_to_vmem [thread:$0]  %s157_s0, 64, %s16_s10, [#allocation3]  }
  0x11   :  { %108 = dma.done.wait [#allocation3], 64  }
  0x12   :  { %109 = vsyncadd [#allocation3], 4294967232  ;;  %v27_v0 = vlaneseq  ;;  %v113_v1 = vmov 1983009808   ;;  %v25_v7 = vld [vmem:[%s158_s1] sm:$0x3] }
  0x13   :  { %v37_v2 = vunpack.c.l.s4 %v113_v1  ;;  %v24_v12 = vld [vmem:[#allocation2] sm:$0xf]  ;;  %s114_s23 = smov [#allocation5]  }
  0x14   :  { %v28_v3 = vshrl.u32 %v27_v0, 7  ;;  %s52_s0 = sshll.u32 %s114_s23, 4  ;;  %s53_s0 = int_to_ptr.vmem [resolvable:$true] %s52_s0 }
  0x15   :  { %v38_v6 = vunpack.c.0.s8 %v37_v2  ;;  %s86_s24 = scalar_lea.vmem %s53_s0, 64  ;;  %p91_p9 = scmp.lt.s32.totalorder %s53_s0, %s53_s0 }
  0x16   :  { %v29_v4 = vsub.s32 0, %v28_v3  ;;  %v33_v5 = vsub.s32 1, %v28_v3  ;;  %p87_p8 = scmp.ne.s32.totalorder %s53_s0, %s86_s24  ;;  %p92_p10 = scmp.lt.s32.totalorder %s86_s24, %s86_s24 }
  0x17   :  { %v41_v10 = vsub.s32 %v38_v6, %v28_v3 }
  0x18   :  { %v30_v8 = vrot.slane %v25_v7, %v29_v4  ;;  %v34_v9 = vrot.slane %v25_v7, %v33_v5  ;;  %p93_p11 = por %p92_p10, %p91_p9 }
  0x1a   :  { %v35_v11 = vcombine.low %v30_v8, %v34_v9  ;;  %p94_p12 = pnand %p93_p11, %p87_p8 }
  0x1c   :  { %v42_v13 = vrot.slane %v35_v11, %v41_v10 }
  0x1e   :  { %v44_v14 = vadd.f32 %v42_v13, %v24_v12 }
  0x20   :  { %45 = vst [vmem:[#allocation5] sm:$0xf] %v44_v14 }
  0x21   :  { %97 = shalt.err (!%p94_p12)
}
  0x22   :  { %s98_s26 = scalar_lea.hbm %s159_s2, 64 }
  0x23   :  { %p99_p13 = scmp.ne.s32.totalorder %s159_s2, %s98_s26  ;;  %p102_p0 = scmp.lt.u32.totalorder %s98_s26, %s159_s2 }
  0x25   :  { %p104_p1 = pnand %p102_p0, %p99_p13 }
  0x27   :  { %107 = shalt.err (!%p104_p1)
}
  0x28   :  { %55 = dma.vmem_to_hbm [thread:$0]  %s53_s0, 64, %s159_s2, [#allocation4]  }
  0x29   :  { %110 = dma.done.wait [#allocation4], 64  }
  0x2a   :  { %111 = vsyncadd [#allocation4], 4294967232 }
  0x2b   :  { %59 = vsyncpa [#allocation3], 1 }
  0x2c   :  { %60 = vsyncpa [#allocation4], 1 }

</bundles_post_ra>
